<compile_context>
chip_gen: v7x
topology: tpu7x:2x2x1
jax: 0.10.0
libtpu: 0.0.40
codegen_flags: <defaults>
</compile_context>

<pallas_src>
import jax
import jax.numpy as jnp
from jax.experimental import pallas as pl
from jax.experimental.pallas import tpu as pltpu

INPUT_DIM = 45
EMB_DIM = 45
ENCODER_DEPTH = 5
NUM_CLASSES = 2


def _round_up(n, m):
    return ((n + m - 1) // m) * m


def _finetune_kernel(x_ref, w0, b0, w1, b1, w2, b2, w3, b3, wf, bf, out_ref):
    # x_ref: (TB, 45) bf16, weights bf16, biases f32 (1, out), out_ref (TB, 2) f32.
    h = x_ref[...]
    for w_ref, b_ref in ((w0, b0), (w1, b1), (w2, b2), (w3, b3)):
        acc = jnp.dot(h, w_ref[...], preferred_element_type=jnp.float32) + b_ref[...]
        acc = jnp.maximum(acc, 0.0)            # ReLU + bias stay f32 on the VPU
        h = acc.astype(jnp.bfloat16)           # narrow only the MXU operand
    out = jnp.dot(h, wf[...], preferred_element_type=jnp.float32) + bf[...]
    out_ref[...] = out.astype(out_ref.dtype)


def finetune_forward(x, params, *, block_rows=256):
    """x: (B, 45) f32; params: 6 (W(in,out), b(out,)) pairs (5 encoder + 1 head)."""
    B = x.shape[0]

    # --- host-side exact fusion of the two back-to-back Linear layers ---
    w4, b4 = params[4]
    w5, b5 = params[5]
    w_fused = w4 @ w5                      # (45, 2)
    b_fused = b4 @ w5 + b5                 # (2,)
    ws = [params[i][0] for i in range(ENCODER_DEPTH - 1)] + [w_fused]
    bs = [params[i][1] for i in range(ENCODER_DEPTH - 1)] + [b_fused]

    flat = []
    for w, b in zip(ws, bs):
        flat.append(w.astype(jnp.bfloat16))
        flat.append(b.reshape(1, -1).astype(jnp.float32))

    # --- batch tiling (TB multiple of 16 to satisfy bf16 sublane packing) ---
    tb = min(block_rows, _round_up(max(B, 1), 16))
    b_pad = _round_up(B, tb)
    x_bf16 = x.astype(jnp.bfloat16)
    if b_pad != B:
        x_bf16 = jnp.pad(x_bf16, ((0, b_pad - B), (0, 0)))
    grid = (b_pad // tb,)

    const_map = lambda i: (0, 0)           # weights/biases resident in VMEM
    in_specs = [pl.BlockSpec((tb, INPUT_DIM), lambda i: (i, 0))]
    for arr in flat:
        in_specs.append(pl.BlockSpec(arr.shape, const_map))
    out_spec = pl.BlockSpec((tb, NUM_CLASSES), lambda i: (i, 0))

    weight_bytes = sum(int(a.size) * a.dtype.itemsize for a in flat)
    flops = 2 * b_pad * INPUT_DIM * ((ENCODER_DEPTH - 1) * EMB_DIM + NUM_CLASSES)
    bytes_accessed = b_pad * INPUT_DIM * 2 + b_pad * NUM_CLASSES * 4 + weight_bytes

    out_pad = pl.pallas_call(
        _finetune_kernel,
        out_shape=jax.ShapeDtypeStruct((b_pad, NUM_CLASSES), jnp.float32),
        grid=grid,
        in_specs=in_specs,
        out_specs=out_spec,
        compiler_params=pltpu.CompilerParams(dimension_semantics=("parallel",)),
        cost_estimate=pl.CostEstimate(
            flops=flops, transcendentals=0, bytes_accessed=bytes_accessed),
    )(x_bf16, *flat)
    return out_pad[:B]


def init_params(key):
    """PyTorch-style uniform(+/- 1/sqrt(fan_in)) init for all 6 Linear layers."""
    dims = []
    in_dim = INPUT_DIM
    for _ in range(ENCODER_DEPTH - 1):
        dims.append((in_dim, EMB_DIM))
        in_dim = EMB_DIM
    dims.append((in_dim, EMB_DIM))          # final encoder linear (no ReLU)
    dims.append((EMB_DIM, NUM_CLASSES))     # head linear
    params = []
    for fan_in, fan_out in dims:
        key, kw, kb = jax.random.split(key, 3)
        bound = 1.0 / jnp.sqrt(jnp.float32(fan_in))
        w = jax.random.uniform(kw, (fan_in, fan_out), jnp.float32, -bound, bound)
        b = jax.random.uniform(kb, (fan_out,), jnp.float32, -bound, bound)
        params.append((w, b))
    return params


def reference_forward(x, params):
    """Pure-f32 module semantics (6 Linear layers, ReLU after the first 4)."""
    h = x
    for i, (w, b) in enumerate(params):
        h = h @ w + b
        if i < ENCODER_DEPTH - 1:
            h = jnp.maximum(h, 0.0)
    return h


def reference_forward_bf16(x, params):
    """Mirrors the kernel math (host fusion, bf16 dot operands, f32 accumulate)."""
    w_f = params[4][0] @ params[5][0]
    b_f = params[4][1] @ params[5][0] + params[5][1]
    ws = [params[i][0] for i in range(4)] + [w_f]
    bs = [params[i][1] for i in range(4)] + [b_f]
    h = x.astype(jnp.bfloat16)
    for i in range(4):
        h = jnp.dot(h, ws[i].astype(jnp.bfloat16),
                    preferred_element_type=jnp.float32) + bs[i]
        h = jnp.maximum(h, 0.0).astype(jnp.bfloat16)
    return jnp.dot(h, ws[4].astype(jnp.bfloat16),
                   preferred_element_type=jnp.float32) + bs[4]


if __name__ == "__main__":
    key = jax.random.PRNGKey(0)
    key, kx = jax.random.split(key)

    B = 8
    x = jax.random.normal(kx, (B, INPUT_DIM), jnp.float32)
    params = init_params(key)

    out = finetune_forward(x, params)
    out = jax.block_until_ready(out)

    assert out.shape == (B, NUM_CLASSES), out.shape

    # Strict check against a reference computing the exact same (bf16-fed) math.
    ref_bf16 = reference_forward_bf16(x, params)
    assert jnp.allclose(out, ref_bf16, atol=2e-3, rtol=2e-3), \
        "mismatch vs bf16-path reference"

    # Semantic check against the pure-f32 module forward (bf16-sized tolerance).
    ref_f32 = reference_forward(x, params)
    assert jnp.allclose(out, ref_f32, atol=5e-2, rtol=5e-2), \
        "mismatch vs f32 module reference"

    print("KERNEL_OK")
</pallas_src>

<mosaic_0001>
module attributes {stable_mosaic.version = 11 : i64} {
  func.func @_finetune_kernel(%arg0: i32, %arg1: memref<16x45xbf16, #tpu.memory_space<vmem>>, %arg2: memref<45x45xbf16, #tpu.memory_space<vmem>>, %arg3: memref<1x45xf32, #tpu.memory_space<vmem>>, %arg4: memref<45x45xbf16, #tpu.memory_space<vmem>>, %arg5: memref<1x45xf32, #tpu.memory_space<vmem>>, %arg6: memref<45x45xbf16, #tpu.memory_space<vmem>>, %arg7: memref<1x45xf32, #tpu.memory_space<vmem>>, %arg8: memref<45x45xbf16, #tpu.memory_space<vmem>>, %arg9: memref<1x45xf32, #tpu.memory_space<vmem>>, %arg10: memref<45x2xbf16, #tpu.memory_space<vmem>>, %arg11: memref<1x2xf32, #tpu.memory_space<vmem>>, %arg12: memref<16x2xf32, #tpu.memory_space<vmem>>) attributes {dimension_semantics = [#tpu.dimension_semantics<parallel>], iteration_bounds = array<i64: 1>, scalar_prefetch = 0 : i64, scratch_operands = 0 : i64, tpu.core_type = #tpu.core_type<tc>, window_params = [{transform_indices = @transform_0, window_bounds = array<i64: 16, 45>}, {pipeline_mode = #tpu.pipeline_mode<synchronous>, transform_indices = @transform_1, window_bounds = array<i64: 45, 45>}, {pipeline_mode = #tpu.pipeline_mode<synchronous>, transform_indices = @transform_2, window_bounds = array<i64: 1, 45>}, {pipeline_mode = #tpu.pipeline_mode<synchronous>, transform_indices = @transform_3, window_bounds = array<i64: 45, 45>}, {pipeline_mode = #tpu.pipeline_mode<synchronous>, transform_indices = @transform_4, window_bounds = array<i64: 1, 45>}, {pipeline_mode = #tpu.pipeline_mode<synchronous>, transform_indices = @transform_5, window_bounds = array<i64: 45, 45>}, {pipeline_mode = #tpu.pipeline_mode<synchronous>, transform_indices = @transform_6, window_bounds = array<i64: 1, 45>}, {pipeline_mode = #tpu.pipeline_mode<synchronous>, transform_indices = @transform_7, window_bounds = array<i64: 45, 45>}, {pipeline_mode = #tpu.pipeline_mode<synchronous>, transform_indices = @transform_8, window_bounds = array<i64: 1, 45>}, {pipeline_mode = #tpu.pipeline_mode<synchronous>, transform_indices = @transform_9, window_bounds = array<i64: 45, 2>}, {pipeline_mode = #tpu.pipeline_mode<synchronous>, transform_indices = @transform_10, window_bounds = array<i64: 1, 2>}, {transform_indices = @transform_11, window_bounds = array<i64: 16, 2>}]} {
    %c0 = arith.constant 0 : index
    %c0_0 = arith.constant 0 : index
    %0 = vector.load %arg1[%c0, %c0_0] : memref<16x45xbf16, #tpu.memory_space<vmem>>, vector<16x45xbf16>
    %c0_1 = arith.constant 0 : index
    %c0_2 = arith.constant 0 : index
    %1 = vector.load %arg2[%c0_1, %c0_2] : memref<45x45xbf16, #tpu.memory_space<vmem>>, vector<45x45xbf16>
    %cst = arith.constant dense<0.000000e+00> : vector<16x45xf32>
    %2 = tpu.matmul %0, %1, %cst {dimension_numbers = #tpu.dot_dimension_numbers<[1], [0], [0], [1], [0, 0, 1, 1], [], []>} : vector<16x45xbf16>, vector<45x45xbf16>, vector<16x45xf32> -> vector<16x45xf32>
    %c0_3 = arith.constant 0 : index
    %c0_4 = arith.constant 0 : index
    %3 = vector.load %arg3[%c0_3, %c0_4] : memref<1x45xf32, #tpu.memory_space<vmem>>, vector<1x45xf32>
    %4 = vector.broadcast %3 : vector<1x45xf32> to vector<16x45xf32>
    %5 = arith.addf %2, %4 : vector<16x45xf32>
    %cst_5 = arith.constant 0.000000e+00 : f32
    %6 = vector.broadcast %cst_5 : f32 to vector<16x45xf32>
    %7 = arith.maximumf %5, %6 : vector<16x45xf32>
    %8 = arith.truncf %7 : vector<16x45xf32> to vector<16x45xbf16>
    %c0_6 = arith.constant 0 : index
    %c0_7 = arith.constant 0 : index
    %9 = vector.load %arg4[%c0_6, %c0_7] : memref<45x45xbf16, #tpu.memory_space<vmem>>, vector<45x45xbf16>
    %cst_8 = arith.constant dense<0.000000e+00> : vector<16x45xf32>
    %10 = tpu.matmul %8, %9, %cst_8 {dimension_numbers = #tpu.dot_dimension_numbers<[1], [0], [0], [1], [0, 0, 1, 1], [], []>} : vector<16x45xbf16>, vector<45x45xbf16>, vector<16x45xf32> -> vector<16x45xf32>
    %c0_9 = arith.constant 0 : index
    %c0_10 = arith.constant 0 : index
    %11 = vector.load %arg5[%c0_9, %c0_10] : memref<1x45xf32, #tpu.memory_space<vmem>>, vector<1x45xf32>
    %12 = vector.broadcast %11 : vector<1x45xf32> to vector<16x45xf32>
    %13 = arith.addf %10, %12 : vector<16x45xf32>
    %cst_11 = arith.constant 0.000000e+00 : f32
    %14 = vector.broadcast %cst_11 : f32 to vector<16x45xf32>
    %15 = arith.maximumf %13, %14 : vector<16x45xf32>
    %16 = arith.truncf %15 : vector<16x45xf32> to vector<16x45xbf16>
    %c0_12 = arith.constant 0 : index
    %c0_13 = arith.constant 0 : index
    %17 = vector.load %arg6[%c0_12, %c0_13] : memref<45x45xbf16, #tpu.memory_space<vmem>>, vector<45x45xbf16>
    %cst_14 = arith.constant dense<0.000000e+00> : vector<16x45xf32>
    %18 = tpu.matmul %16, %17, %cst_14 {dimension_numbers = #tpu.dot_dimension_numbers<[1], [0], [0], [1], [0, 0, 1, 1], [], []>} : vector<16x45xbf16>, vector<45x45xbf16>, vector<16x45xf32> -> vector<16x45xf32>
    %c0_15 = arith.constant 0 : index
    %c0_16 = arith.constant 0 : index
    %19 = vector.load %arg7[%c0_15, %c0_16] : memref<1x45xf32, #tpu.memory_space<vmem>>, vector<1x45xf32>
    %20 = vector.broadcast %19 : vector<1x45xf32> to vector<16x45xf32>
    %21 = arith.addf %18, %20 : vector<16x45xf32>
    %cst_17 = arith.constant 0.000000e+00 : f32
    %22 = vector.broadcast %cst_17 : f32 to vector<16x45xf32>
    %23 = arith.maximumf %21, %22 : vector<16x45xf32>
    %24 = arith.truncf %23 : vector<16x45xf32> to vector<16x45xbf16>
    %c0_18 = arith.constant 0 : index
    %c0_19 = arith.constant 0 : index
    %25 = vector.load %arg8[%c0_18, %c0_19] : memref<45x45xbf16, #tpu.memory_space<vmem>>, vector<45x45xbf16>
    %cst_20 = arith.constant dense<0.000000e+00> : vector<16x45xf32>
    %26 = tpu.matmul %24, %25, %cst_20 {dimension_numbers = #tpu.dot_dimension_numbers<[1], [0], [0], [1], [0, 0, 1, 1], [], []>} : vector<16x45xbf16>, vector<45x45xbf16>, vector<16x45xf32> -> vector<16x45xf32>
    %c0_21 = arith.constant 0 : index
    %c0_22 = arith.constant 0 : index
    %27 = vector.load %arg9[%c0_21, %c0_22] : memref<1x45xf32, #tpu.memory_space<vmem>>, vector<1x45xf32>
    %28 = vector.broadcast %27 : vector<1x45xf32> to vector<16x45xf32>
    %29 = arith.addf %26, %28 : vector<16x45xf32>
    %cst_23 = arith.constant 0.000000e+00 : f32
    %30 = vector.broadcast %cst_23 : f32 to vector<16x45xf32>
    %31 = arith.maximumf %29, %30 : vector<16x45xf32>
    %32 = arith.truncf %31 : vector<16x45xf32> to vector<16x45xbf16>
    %c0_24 = arith.constant 0 : index
    %c0_25 = arith.constant 0 : index
    %33 = vector.load %arg10[%c0_24, %c0_25] : memref<45x2xbf16, #tpu.memory_space<vmem>>, vector<45x2xbf16>
    %cst_26 = arith.constant dense<0.000000e+00> : vector<16x2xf32>
    %34 = tpu.matmul %32, %33, %cst_26 {dimension_numbers = #tpu.dot_dimension_numbers<[1], [0], [0], [1], [0, 0, 1, 1], [], []>} : vector<16x45xbf16>, vector<45x2xbf16>, vector<16x2xf32> -> vector<16x2xf32>
    %c0_27 = arith.constant 0 : index
    %c0_28 = arith.constant 0 : index
    %35 = vector.load %arg11[%c0_27, %c0_28] : memref<1x2xf32, #tpu.memory_space<vmem>>, vector<1x2xf32>
    %36 = vector.broadcast %35 : vector<1x2xf32> to vector<16x2xf32>
    %37 = arith.addf %34, %36 : vector<16x2xf32>
    %c0_29 = arith.constant 0 : index
    %c0_30 = arith.constant 0 : index
    %38 = vector.load %arg12[%c0_29, %c0_30] : memref<16x2xf32, #tpu.memory_space<vmem>>, vector<16x2xf32>
    tpu.vector_store %arg12[%c0_29, %c0_30], %37 {strides = array<i32>} : memref<16x2xf32, #tpu.memory_space<vmem>>, vector<16x2xf32>,
    return
  }
  func.func @transform_0(%arg0: i32) -> (i32, i32) {
    %c0_i32 = arith.constant 0 : i32
    %c0_i32_0 = arith.constant 0 : i32
    return %arg0, %c0_i32 : i32, i32
  }
  func.func @transform_1(%arg0: i32) -> (i32, i32) {
    %c0_i32 = arith.constant 0 : i32
    %c0_i32_0 = arith.constant 0 : i32
    %c0_i32_1 = arith.constant 0 : i32
    return %c0_i32, %c0_i32_0 : i32, i32
  }
  func.func @transform_2(%arg0: i32) -> (i32, i32) {
    %c0_i32 = arith.constant 0 : i32
    %c0_i32_0 = arith.constant 0 : i32
    %c0_i32_1 = arith.constant 0 : i32
    return %c0_i32, %c0_i32_0 : i32, i32
  }
  func.func @transform_3(%arg0: i32) -> (i32, i32) {
    %c0_i32 = arith.constant 0 : i32
    %c0_i32_0 = arith.constant 0 : i32
    %c0_i32_1 = arith.constant 0 : i32
    return %c0_i32, %c0_i32_0 : i32, i32
  }
  func.func @transform_4(%arg0: i32) -> (i32, i32) {
    %c0_i32 = arith.constant 0 : i32
    %c0_i32_0 = arith.constant 0 : i32
    %c0_i32_1 = arith.constant 0 : i32
    return %c0_i32, %c0_i32_0 : i32, i32
  }
  func.func @transform_5(%arg0: i32) -> (i32, i32) {
    %c0_i32 = arith.constant 0 : i32
    %c0_i32_0 = arith.constant 0 : i32
    %c0_i32_1 = arith.constant 0 : i32
    return %c0_i32, %c0_i32_0 : i32, i32
  }
  func.func @transform_6(%arg0: i32) -> (i32, i32) {
    %c0_i32 = arith.constant 0 : i32
    %c0_i32_0 = arith.constant 0 : i32
    %c0_i32_1 = arith.constant 0 : i32
    return %c0_i32, %c0_i32_0 : i32, i32
  }
  func.func @transform_7(%arg0: i32) -> (i32, i32) {
    %c0_i32 = arith.constant 0 : i32
    %c0_i32_0 = arith.constant 0 : i32
    %c0_i32_1 = arith.constant 0 : i32
    return %c0_i32, %c0_i32_0 : i32, i32
  }
  func.func @transform_8(%arg0: i32) -> (i32, i32) {
    %c0_i32 = arith.constant 0 : i32
    %c0_i32_0 = arith.constant 0 : i32
    %c0_i32_1 = arith.constant 0 : i32
    return %c0_i32, %c0_i32_0 : i32, i32
  }
  func.func @transform_9(%arg0: i32) -> (i32, i32) {
    %c0_i32 = arith.constant 0 : i32
    %c0_i32_0 = arith.constant 0 : i32
    %c0_i32_1 = arith.constant 0 : i32
    return %c0_i32, %c0_i32_0 : i32, i32
  }
  func.func @transform_10(%arg0: i32) -> (i32, i32) {
    %c0_i32 = arith.constant 0 : i32
    %c0_i32_0 = arith.constant 0 : i32
    %c0_i32_1 = arith.constant 0 : i32
    return %c0_i32, %c0_i32_0 : i32, i32
  }
  func.func @transform_11(%arg0: i32) -> (i32, i32) {
    %c0_i32 = arith.constant 0 : i32
    %c0_i32_0 = arith.constant 0 : i32
    return %arg0, %c0_i32 : i32, i32
  }
}

</mosaic_0001>

<bundles_post_ra>
// kernel: tpu_custom_call.1
= control target key start
LH: loop header
LB: loop body
LE: loop exit
PB: predicated region body
PF: predicated region fallthrough
CT: control target
= control target key end

     0   :  { %16 = vsyncpa [#allocation3], 0  ;;  %s893_s0 = inlined_call_operand.hbm [shape: bf16[16,45], index: 0, kind: input, shape index: {}]   ;;  %s894_s1 = inlined_call_operand.vmem [shape: bf16[45,45], index: 1, kind: input, shape index: {}]   ;;  %s895_s2 = inlined_call_operand.vmem [shape: f32[1,45], index: 2, kind: input, shape index: {}]   ;;  %s896_s3 = inlined_call_operand.hbm [shape: bf16[45,45], index: 3, kind: input, shape index: {}]   ;;  %s897_s4 = inlined_call_operand.vmem [shape: f32[1,45], index: 4, kind: input, shape index: {}]   ;;  %s898_s5 = inlined_call_operand.hbm [shape: bf16[45,45], index: 5, kind: input, shape index: {}]   ;;  %s899_s6 = inlined_call_operand.vmem [shape: f32[1,45], index: 6, kind: input, shape index: {}]   ;;  %s900_s7 = inlined_call_operand.vmem [shape: bf16[45,45], index: 7, kind: input, shape index: {}]   ;;  %s901_s8 = inlined_call_operand.vmem [shape: f32[1,45], index: 8, kind: input, shape index: {}]   ;;  %s902_s9 = inlined_call_operand.vmem [shape: bf16[45,2], index: 9, kind: input, shape index: {}]   ;;  %s903_s10 = inlined_call_operand.vmem [shape: f32[1,2], index: 10, kind: input, shape index: {}]   ;;  %s904_s11 = inlined_call_operand.vmem [shape: f32[16,2], index: 11, kind: output, shape index: {}]  }
   0x1   :  { %17 = vsyncpa [#allocation5], 0  ;;  %s688_s17 = smov [#allocation4]   ;;  %s689_s19 = smov [#allocation2]  }
   0x2   :  { %s39_s18 = sshll.u32 %s688_s17, 4  ;;  %s23_s20 = sshll.u32 %s689_s19, 4  ;;  %s40_s18 = int_to_ptr.vmem [resolvable:$true] %s39_s18  ;;  %s756_s20 = int_to_ptr.vmem [resolvable:$true] %s23_s20 }
   0x3   :  { %s618_s23 = scalar_lea.hbm %s896_s3, 384 }
   0x4   :  { %p619_p0 = scmp.ne.s32.totalorder %s896_s3, %s618_s23  ;;  %p622_p1 = scmp.lt.u32.totalorder %s618_s23, %s896_s3 }
   0x6   :  { %p624_p2 = pnand %p622_p1, %p619_p0 }
   0x8   :  { %627 = shalt.err (!%p624_p2)
}
   0x9   :  { %s628_s28 = scalar_lea.vmem %s40_s18, 384  ;;  %p633_p4 = scmp.lt.s32.totalorder %s40_s18, %s40_s18 }
   0xa   :  { %p629_p3 = scmp.ne.s32.totalorder %s40_s18, %s628_s28  ;;  %p634_p5 = scmp.lt.s32.totalorder %s628_s28, %s628_s28 }
   0xc   :  { %p635_p6 = por %p634_p5, %p633_p4 }
   0xe   :  { %p636_p7 = pnand %p635_p6, %p629_p3 }
  0x10   :  { %639 = shalt.err (!%p636_p7)
}
  0x11   :  { %s690_s29 = smov 64   ;;  %s691_s30 = smov 4  }
  0x12   :  { %45 = dma.hbm_to_vmem [thread:$0]  %s896_s3, 384, %s40_s18, [#allocation5], %s690_s29, %s690_s29, %s691_s30  }
  0x13   :  { %s640_s16 = scalar_lea.hbm %s893_s0, 128 }
  0x14   :  { %p641_p8 = scmp.ne.s32.totalorder %s893_s0, %s640_s16  ;;  %p644_p9 = scmp.lt.u32.totalorder %s640_s16, %s893_s0 }
  0x16   :  { %p646_p10 = pnand %p644_p9, %p641_p8 }
  0x18   :  { %649 = shalt.err (!%p646_p10)
}
  0x19   :  { %s650_s23 = scalar_lea.vmem %s756_s20, 128  ;;  %p655_p12 = scmp.lt.s32.totalorder %s756_s20, %s756_s20 }
  0x1a   :  { %p651_p11 = scmp.ne.s32.totalorder %s756_s20, %s650_s23  ;;  %p656_p13 = scmp.lt.s32.totalorder %s650_s23, %s650_s23 }
  0x1c   :  { %p657_p0 = por %p656_p13, %p655_p12 }
  0x1e   :  { %p658_p1 = pnand %p657_p0, %p651_p11 }
  0x20   :  { %661 = shalt.err (!%p658_p1)
}
  0x21   :  { %29 = dma.hbm_to_vmem [thread:$0]  %s893_s0, 128, %s756_s20, [#allocation3], %s690_s29, %s690_s29, %s691_s30  }
  0x22   :  { %s692_s24 = smov [#allocation6]   ;;  %s662_s28 = scalar_lea.hbm %s898_s5, 384 }
  0x23   :  { %s53_s25 = sshll.u32 %s692_s24, 4  ;;  %p663_p2 = scmp.ne.s32.totalorder %s898_s5, %s662_s28  ;;  %s54_s25 = int_to_ptr.vmem [resolvable:$true] %s53_s25 }
  0x24   :  { %p666_p3 = scmp.lt.u32.totalorder %s662_s28, %s898_s5 }
  0x26   :  { %p668_p4 = pnand %p666_p3, %p663_p2 }
  0x28   :  { %671 = shalt.err (!%p668_p4)
}
  0x29   :  { %s672_s16 = scalar_lea.vmem %s54_s25, 384  ;;  %p677_p6 = scmp.lt.s32.totalorder %s54_s25, %s54_s25 }
  0x2a   :  { %p673_p5 = scmp.ne.s32.totalorder %s54_s25, %s672_s16  ;;  %p678_p7 = scmp.lt.s32.totalorder %s672_s16, %s672_s16 }
  0x2c   :  { %p679_p8 = por %p678_p7, %p677_p6 }
  0x2e   :  { %p680_p9 = pnand %p679_p8, %p673_p5 }
  0x30   :  { %683 = shalt.err (!%p680_p9)
}
  0x31   :  { %59 = dma.hbm_to_vmem [thread:$0]  %s898_s5, 384, %s54_s25, [#allocation5], %s690_s29, %s690_s29, %s691_s30  }
  0x32   :  { %684 = dma.done.wait [#allocation3], 128  }
  0x33   :  { %685 = vsyncadd [#allocation3], 4294967168 }
  0x34   :  { %686 = dma.done.wait [#allocation5], 768  }
  0x35   :  { %687 = vsyncadd [#allocation5], 4294966528  ;;  %v693_v0 = vmov 0.0   ;;  %vm694_vm0 = vmmov 0   ;;  %vm121_vm1 = vcmask 1045504   ;;  %vm122_vm2 = vcmask 1046528  }
  0x36   :  { %544 = vmatprep.subr.bf16.mxu0 %v693_v0  ;;  %554 = vmatprep.subr.bf16.mxu1 %v693_v0  ;;  %v602_v1 = vld [vmem:[%s894_s1] sm:$0xff]   ;;  %v695_v2 = vmov 65535   ;;  %v603_v4 = vld [vmem:[%s894_s1 + $0x8] sm:$0xff]   ;;  %v604_v5 = vld [vmem:[%s894_s1 + $0x10] sm:$0x7f]   ;;  %vm117_vm3 = vcmask 367616  }
  0x37   :  { %550 = vmatprep.mubr.msk.bf16.mxu0 %vm694_vm0, %v693_v0  ;;  %560 = vmatprep.mubr.msk.bf16.mxu1 %vm694_vm0, %v693_v0  ;;  %v123_v3 = vsel %vm121_vm1, 4294967295, %v695_v2  ;;  %v606_v7 = vld [vmem:[#allocation4] sm:$0xff]   ;;  %v605_v9 = vld [vmem:[#allocation2] sm:$0xff]   ;;  %v607_v10 = vld [vmem:[#allocation4 + $0x8] sm:$0xff]   ;;  %vm489_vm4 = vcmask 15360  }
  0x38   :  { %545 = vmatpush3.bf16.msra.mxu0 %v602_v1  ;;  %v824_v6 = vsel %vm122_vm2, %v123_v3, 0  ;;  %555 = vmatpush3.bf16.msra.mxu1 %v606_v7  ;;  %v608_v11 = vld [vmem:[#allocation4 + $0x10] sm:$0x7f]   ;;  %v609_v13 = vld [vmem:[#allocation6] sm:$0xff]   ;;  %v610_v24 = vld [vmem:[#allocation6 + $0x8] sm:$0xff]  }
  0x39   :  { %546 = vmatprep.subr.bf16.mxu0 %v693_v0  ;;  %v126_v8 = vand.u32 %v604_v5, %v824_v6  ;;  %556 = vmatprep.subr.bf16.mxu1 %v693_v0  ;;  %v206_v12 = vand.u32 %v608_v11, %v824_v6  ;;  %v498_v14 = vld [vmem:[%s895_s2] ss:$0 sm:$0xff]  ;;  %v611_v25 = vld [vmem:[#allocation6 + $0x10] sm:$0x7f]   ;;  %v613_v38 = vld [vmem:[%s900_s7 + $0x8] sm:$0xff]  }
  0x3a   :  { %v286_v26 = vand.u32 %v611_v25, %v824_v6  ;;  %v612_v27 = vld [vmem:[%s900_s7] sm:$0xff]   ;;  %v614_v39 = vld [vmem:[%s900_s7 + $0x10] sm:$0x7f]   ;;  %v616_v52 = vld [vmem:[%s902_s9 + $0x8] sm:$0xff]  }
  0x3b   :  { %v504_v28 = vld [vmem:[%s897_s4] ss:$0 sm:$0xff]  ;;  %v366_v40 = vand.u32 %v614_v39, %v824_v6  ;;  %v617_v53 = vld [vmem:[%s902_s9 + $0x10] sm:$0x7f]  }
  0x3c   :  { %547 = vmatpush3.bf16.msra.mxu0 %v603_v4  ;;  %557 = vmatpush3.bf16.msra.mxu1 %v607_v10  ;;  %v615_v41 = vld [vmem:[%s902_s9] sm:$0xff]   ;;  %v446_v54 = vand.u32 %v617_v53, %v824_v6 }
  0x3d   :  { %548 = vmatprep.subr.bf16.mxu0 %v693_v0  ;;  %558 = vmatprep.subr.bf16.mxu1 %v693_v0  ;;  %v509_v42 = vld [vmem:[%s899_s6] ss:$0 sm:$0xff] }
  0x3e   :  { %v514_v55 = vld [vmem:[%s901_s8] ss:$0 sm:$0xff] }
  0x40   :  { %549 = vmatpush3.bf16.msra.mxu0 %v126_v8  ;;  %559 = vmatpush3.bf16.msra.mxu1 %v206_v12 }
  0x41   :  { %564 = vmatprep.subr.bf16.mxu0 %v693_v0  ;;  %574 = vmatprep.subr.bf16.mxu1 %v693_v0 }
  0x43   :  { %551 = vmatmul.mubr.msk.bf16.vlgmr.msra.gmra.mrb[0].mxu0 %vm117_vm3, %v605_v9 }
  0x44   :  { %570 = vmatprep.mubr.msk.bf16.mxu0 %vm694_vm0, %v693_v0  ;;  %565 = vmatpush3.bf16.msra.mxu0 %v609_v13 }
  0x45   :  { %566 = vmatprep.subr.bf16.mxu0 %v693_v0 }
  0x48   :  { %567 = vmatpush3.bf16.msra.mxu0 %v610_v24 }
  0x49   :  { %568 = vmatprep.subr.bf16.mxu0 %v693_v0 }
  0x4c   :  { %569 = vmatpush3.bf16.msra.mxu0 %v286_v26 }
  0x4d   :  { %584 = vmatprep.subr.bf16.mxu0 %v693_v0 }
 0x116   :  { %v162_v15 = vpop.f32.mrb[0].mxu0 }
 0x117   :  { %v163_v16 = vadd.f32 %v498_v14, %v162_v15  ;;  %v552_v17 = vpop.f32.mrb[1].mxu0 }
 0x118   :  { %v165_v18 = vpop.f32.mrb[2].mxu0 }
 0x119   :  { %v166_v19 = vadd.f32 %v498_v14, %v165_v18  ;;  %v553_v20 = vpop.f32.mrb[3].mxu0  ;;  %v169_v21 = vmax.f32 %v163_v16, 0.0 }
 0x11b   :  { %v170_v22 = vmax.f32 %v166_v19, 0.0 }
 0x11d   :  { %v171_v23 = vpack.c.bf16 %v170_v22, %v169_v21 }
 0x11f   :  { %561 = vmatmul.mubr.msk.bf16.vlgmr.msra.gmra.mrb[0].mxu1 %vm117_vm3, %v171_v23 }
 0x120   :  { %580 = vmatprep.mubr.msk.bf16.mxu1 %vm694_vm0, %v693_v0  ;;  %575 = vmatpush3.bf16.msra.mxu1 %v612_v27 }
 0x121   :  { %576 = vmatprep.subr.bf16.mxu1 %v693_v0 }
 0x124   :  { %577 = vmatpush3.bf16.msra.mxu1 %v613_v38 }
 0x125   :  { %578 = vmatprep.subr.bf16.mxu1 %v693_v0 }
 0x128   :  { %579 = vmatpush3.bf16.msra.mxu1 %v366_v40 }
 0x1f2   :  { %v242_v29 = vpop.f32.mrb[0].mxu1 }
 0x1f3   :  { %v243_v30 = vadd.f32 %v504_v28, %v242_v29  ;;  %v562_v31 = vpop.f32.mrb[1].mxu1 }
 0x1f4   :  { %v245_v32 = vpop.f32.mrb[2].mxu1 }
 0x1f5   :  { %v246_v33 = vadd.f32 %v504_v28, %v245_v32  ;;  %v563_v34 = vpop.f32.mrb[3].mxu1  ;;  %v249_v35 = vmax.f32 %v243_v30, 0.0 }
 0x1f7   :  { %v250_v36 = vmax.f32 %v246_v33, 0.0 }
 0x1f9   :  { %v251_v37 = vpack.c.bf16 %v250_v36, %v249_v35 }
 0x1fb   :  { %571 = vmatmul.mubr.msk.bf16.vlgmr.msra.gmra.mrb[4].mxu0 %vm117_vm3, %v251_v37 }
 0x1fc   :  { %590 = vmatprep.mubr.msk.bf16.mxu0 %vm694_vm0, %v693_v0  ;;  %585 = vmatpush3.bf16.msra.mxu0 %v615_v41 }
 0x1fd   :  { %586 = vmatprep.subr.bf16.mxu0 %v693_v0 }
 0x200   :  { %587 = vmatpush3.bf16.msra.mxu0 %v616_v52 }
 0x201   :  { %588 = vmatprep.subr.bf16.mxu0 %v693_v0  ;;  %v519_v0 = vld [vmem:[%s903_s10] ss:$0 sm:$0xff] }
 0x204   :  { %589 = vmatpush3.bf16.msra.mxu0 %v446_v54 }
 0x2ce   :  { %v322_v43 = vpop.f32.mrb[4].mxu0 }
 0x2cf   :  { %v323_v44 = vadd.f32 %v509_v42, %v322_v43  ;;  %v572_v45 = vpop.f32.mrb[5].mxu0 }
 0x2d0   :  { %v325_v46 = vpop.f32.mrb[6].mxu0 }
 0x2d1   :  { %v326_v47 = vadd.f32 %v509_v42, %v325_v46  ;;  %v573_v48 = vpop.f32.mrb[7].mxu0  ;;  %v329_v49 = vmax.f32 %v323_v44, 0.0 }
 0x2d3   :  { %v330_v50 = vmax.f32 %v326_v47, 0.0 }
 0x2d5   :  { %v331_v51 = vpack.c.bf16 %v330_v50, %v329_v49 }
 0x2d7   :  { %581 = vmatmul.mubr.msk.bf16.vlgmr.msra.gmra.mrb[4].mxu1 %vm117_vm3, %v331_v51 }
 0x3aa   :  { %v402_v56 = vpop.f32.mrb[4].mxu1 }
 0x3ab   :  { %v403_v57 = vadd.f32 %v514_v55, %v402_v56  ;;  %v582_v58 = vpop.f32.mrb[5].mxu1 }
 0x3ac   :  { %v405_v59 = vpop.f32.mrb[6].mxu1 }
 0x3ad   :  { %v406_v60 = vadd.f32 %v514_v55, %v405_v59  ;;  %v583_v61 = vpop.f32.mrb[7].mxu1  ;;  %v409_v62 = vmax.f32 %v403_v57, 0.0 }
 0x3af   :  { %v410_v63 = vmax.f32 %v406_v60, 0.0 }
 0x3b1   :  { %v411_v1 = vpack.c.bf16 %v410_v63, %v409_v62 }
 0x3b3   :  { %591 = vmatmul.mubr.msk.bf16.vlgmr.msra.gmra.mrb[8].mxu0 %vm117_vm3, %v411_v1 }
 0x486   :  { %v482_v2 = vpop.f32.mrb[8].mxu0 }
 0x487   :  { %v483_v3 = vadd.f32 %v519_v0, %v482_v2  ;;  %v592_v4 = vpop.f32.mrb[9].mxu0 }
 0x488   :  { %v485_v5 = vpop.f32.mrb[10].mxu0 }
 0x489   :  { %490 = vst.msk [vmem:[%s904_s11] sm:$0xff] %vm489_vm4, %v483_v3  ;;  %v486_v6 = vadd.f32 %v519_v0, %v485_v5  ;;  %v593_v7 = vpop.f32.mrb[11].mxu0 }
 0x48b   :  { %491 = vst.msk [vmem:[%s904_s11 + $0x8] sm:$0xff] %vm489_vm4, %v486_v6 }
 0x48c   :  { %496 = vsyncpa [#allocation3], 1 }
 0x48d   :  { %497 = vsyncpa [#allocation5], 1 }

</bundles_post_ra>
